<compile_context>
chip_gen: v6e
topology: v6e:2x2x1
jax: 0.10.0
libtpu: 0.0.40
codegen_flags: <defaults>
</compile_context>

<pallas_src>
import math
import functools

import jax
import jax.numpy as jnp
from jax import lax
from jax.experimental import pallas as pl
from jax.experimental.pallas import tpu as pltpu


def mhsa_kernel(x_ref, gamma_ref, beta_ref,
                wqkv_ref, bqkv_ref, wo_ref, bo_ref,
                o_ref,
                xn_ref, acc_ref,
                *, num_heads: int, eps: float):
    h = pl.program_id(1)
    S, E = x_ref.shape[1], x_ref.shape[2]
    D = E // num_heads
    scale = 1.0 / math.sqrt(D)

    # ---- LayerNorm once per batch element (head 0); kept in bf16 scratch ----
    @pl.when(h == 0)
    def _():
        x = x_ref[0]                                            # (S, E) fp32
        mean = jnp.mean(x, axis=-1, keepdims=True)
        var = jnp.mean((x - mean) ** 2, axis=-1, keepdims=True)
        xn = (x - mean) * lax.rsqrt(var + eps)
        xn = xn * gamma_ref[...] + beta_ref[...]                # gamma/beta: (1, E)
        xn_ref[...] = xn.astype(jnp.bfloat16)
        acc_ref[...] = jnp.zeros_like(acc_ref)

    xn = xn_ref[...]                                            # (S, E) bf16

    # ---- Fused per-head QKV projection: one MXU pass, fp32 accumulation ----
    qkv = jnp.dot(xn, wqkv_ref[0],
                  preferred_element_type=jnp.float32) + bqkv_ref[0]   # (S, 3D) fp32
    q = qkv[:, 0 * D:1 * D].astype(jnp.bfloat16)
    k = qkv[:, 1 * D:2 * D].astype(jnp.bfloat16)
    v = qkv[:, 2 * D:3 * D].astype(jnp.bfloat16)

    # ---- Scores: contract last dims of both operands (no explicit K transpose) ----
    s = lax.dot_general(q, k, (((1,), (1,)), ((), ())),
                        preferred_element_type=jnp.float32) * scale   # (S, S) fp32

    # ---- Softmax (fp32 math; reciprocal on the EUP) ----
    s = s - jnp.max(s, axis=-1, keepdims=True)
    p = jnp.exp(s)
    p = p * pl.reciprocal(jnp.sum(p, axis=-1, keepdims=True), approx=True)

    # ---- Head output folded straight into the output projection (no concat) ----
    o_h = jnp.dot(p.astype(jnp.bfloat16), v,
                  preferred_element_type=jnp.float32)                 # (S, D)
    acc_ref[...] += jnp.dot(o_h.astype(jnp.bfloat16), wo_ref[0],
                            preferred_element_type=jnp.float32)       # (S, E)

    # ---- Finalize: add output-projection bias and store ----
    @pl.when(h == num_heads - 1)
    def _():
        o_ref[0] = (acc_ref[...] + bo_ref[...]).astype(o_ref.dtype)


def multi_head_self_attention(x, params, *, num_heads: int, eps: float = 1e-5):
    """x: (B, S, E) fp32.  params: dict from pack_params()."""
    B, S, E = x.shape
    assert E % num_heads == 0
    D = E // num_heads
    H = num_heads

    kernel = functools.partial(mhsa_kernel, num_heads=num_heads, eps=eps)
    const2d = lambda shape: pl.BlockSpec(shape, lambda b, h: (0, 0))
    head3d = lambda shape: pl.BlockSpec(shape, lambda b, h: (h, 0, 0))

    return pl.pallas_call(
        kernel,
        out_shape=jax.ShapeDtypeStruct((B, S, E), x.dtype),
        grid_spec=pltpu.PrefetchScalarGridSpec(
            num_scalar_prefetch=0,
            grid=(B, H),                                   # heads innermost (reduction)
            in_specs=[
                pl.BlockSpec((1, S, E), lambda b, h: (b, 0, 0)),   # x
                const2d((1, E)),                                   # LayerNorm gamma (fp32)
                const2d((1, E)),                                   # LayerNorm beta  (fp32)
                head3d((1, E, 3 * D)),                             # per-head fused QKV weights (bf16)
                head3d((1, 1, 3 * D)),                             # per-head fused QKV bias    (fp32)
                head3d((1, D, E)),                                 # per-head rows of Wo^T      (bf16)
                const2d((1, E)),                                   # out-proj bias              (fp32)
            ],
            out_specs=pl.BlockSpec((1, S, E), lambda b, h: (b, 0, 0)),
            scratch_shapes=[
                pltpu.VMEM((S, E), jnp.bfloat16),   # LayerNorm output, reused across heads
                pltpu.VMEM((S, E), jnp.float32),    # output-projection accumulator
            ],
        ),
        compiler_params=pltpu.CompilerParams(
            dimension_semantics=("parallel", "arbitrary"),
            vmem_limit_bytes=32 * 1024 * 1024,
        ),
    )(x, params["gamma"], params["beta"],
      params["wqkv_h"], params["bqkv_h"], params["wo_h"], params["bo"])


def pack_params(gamma, beta, in_proj_w, in_proj_b, out_proj_w, out_proj_b, *, num_heads):
    """Rearrange PyTorch-convention weights into the per-head layout the kernel expects.

    in_proj_w:  (3E, E), rows = [Wq; Wk; Wv]   (PyTorch: y = x @ W.T + b)
    out_proj_w: (E, E)
    """
    E = gamma.shape[0]
    H = num_heads
    D = E // H

    wq_t = in_proj_w[0 * E:1 * E].T            # (E, E): y = x @ wq_t
    wk_t = in_proj_w[1 * E:2 * E].T
    wv_t = in_proj_w[2 * E:3 * E].T

    def per_head_cols(w_t):                    # (E, E) -> (H, E, D)
        return w_t.reshape(E, H, D).transpose(1, 0, 2)

    wqkv_h = jnp.concatenate(
        [per_head_cols(wq_t), per_head_cols(wk_t), per_head_cols(wv_t)],
        axis=-1)                               # (H, E, 3D)

    def per_head_bias(b):                      # (E,) -> (H, 1, D)
        return b.reshape(H, D)[:, None, :]

    bqkv_h = jnp.concatenate(
        [per_head_bias(in_proj_b[0 * E:1 * E]),
         per_head_bias(in_proj_b[1 * E:2 * E]),
         per_head_bias(in_proj_b[2 * E:3 * E])],
        axis=-1)                               # (H, 1, 3D)

    wo_h = out_proj_w.T.reshape(H, D, E)       # per-head rows of Wo^T

    return {
        # kernel inputs (MXU operands in bf16, biases / LN params in fp32)
        "gamma": gamma.reshape(1, E).astype(jnp.float32),
        "beta": beta.reshape(1, E).astype(jnp.float32),
        "wqkv_h": wqkv_h.astype(jnp.bfloat16),
        "bqkv_h": bqkv_h.astype(jnp.float32),
        "wo_h": wo_h.astype(jnp.bfloat16),
        "bo": out_proj_b.reshape(1, E).astype(jnp.float32),
        # fp32 originals kept for the pure-JAX reference
        "_gamma": gamma, "_beta": beta,
        "_wq_t": wq_t, "_wk_t": wk_t, "_wv_t": wv_t,
        "_bq": in_proj_b[0 * E:1 * E], "_bk": in_proj_b[1 * E:2 * E],
        "_bv": in_proj_b[2 * E:3 * E],
        "_wo_t": out_proj_w.T, "_bo": out_proj_b,
    }


def reference_jax(x, params, *, num_heads: int, eps: float = 1e-5):
    """Pure-JAX fp32 reference mirroring PyTorch LayerNorm + MultiheadAttention."""
    B, S, E = x.shape
    D = E // num_heads
    mean = jnp.mean(x, axis=-1, keepdims=True)
    var = jnp.mean((x - mean) ** 2, axis=-1, keepdims=True)
    xn = (x - mean) / jnp.sqrt(var + eps) * params["_gamma"] + params["_beta"]

    q = xn @ params["_wq_t"] + params["_bq"]
    k = xn @ params["_wk_t"] + params["_bk"]
    v = xn @ params["_wv_t"] + params["_bv"]

    def split(t):  # (B,S,E) -> (B,H,S,D)
        return t.reshape(B, S, num_heads, D).transpose(0, 2, 1, 3)

    qh, kh, vh = split(q), split(k), split(v)
    s = jnp.einsum("bhsd,bhtd->bhst", qh, kh) / math.sqrt(D)
    p = jax.nn.softmax(s, axis=-1)
    o = jnp.einsum("bhst,bhtd->bhsd", p, vh)
    o = o.transpose(0, 2, 1, 3).reshape(B, S, E)
    return o @ params["_wo_t"] + params["_bo"]


if __name__ == "__main__":
    # Small shapes consistent with the module (E % H == 0). NOTE: toy sizes are
    # lane-sparse; for real performance keep E and head_dim multiples of 128.
    B, S, E, H = 2, 8, 32, 4
    key = jax.random.PRNGKey(0)
    kx, k0, k1, k2, k3, k4, k5 = jax.random.split(key, 7)

    x = jax.random.normal(kx, (B, S, E), jnp.float32)
    std = 1.0 / math.sqrt(E)
    in_proj_w = jax.random.normal(k0, (3 * E, E), jnp.float32) * std
    in_proj_b = jax.random.normal(k1, (3 * E,), jnp.float32) * 0.01
    out_proj_w = jax.random.normal(k2, (E, E), jnp.float32) * std
    out_proj_b = jax.random.normal(k3, (E,), jnp.float32) * 0.01
    gamma = 1.0 + 0.1 * jax.random.normal(k4, (E,), jnp.float32)
    beta = 0.1 * jax.random.normal(k5, (E,), jnp.float32)

    params = pack_params(gamma, beta, in_proj_w, in_proj_b,
                         out_proj_w, out_proj_b, num_heads=H)

    out = multi_head_self_attention(x, params, num_heads=H)
    out = jax.block_until_ready(out)

    ref = reference_jax(x, params, num_heads=H)
    assert out.shape == (B, S, E)

    # bf16 MXU operands (fp32 accumulation) + approximate reciprocal -> widened tolerance.
    max_err = float(jnp.max(jnp.abs(out - ref)))
    rel_err = float(jnp.linalg.norm(out - ref) / jnp.linalg.norm(ref))
    assert max_err < 1e-1 and rel_err < 2e-2, \
        f"mismatch vs JAX reference (max abs {max_err}, rel {rel_err})"
    print("KERNEL_OK")
</pallas_src>

<mosaic_0001>
module attributes {stable_mosaic.version = 11 : i64} {
  func.func @mhsa_kernel(%arg0: i32, %arg1: i32, %arg2: memref<1x8x32xf32, #tpu.memory_space<vmem>>, %arg3: memref<1x32xf32, #tpu.memory_space<vmem>>, %arg4: memref<1x32xf32, #tpu.memory_space<vmem>>, %arg5: memref<1x32x24xbf16, #tpu.memory_space<vmem>>, %arg6: memref<1x1x24xf32, #tpu.memory_space<vmem>>, %arg7: memref<1x8x32xbf16, #tpu.memory_space<vmem>>, %arg8: memref<1x32xf32, #tpu.memory_space<vmem>>, %arg9: memref<1x8x32xf32, #tpu.memory_space<vmem>>, %arg10: memref<8x32xbf16, #tpu.memory_space<vmem>>, %arg11: memref<8x32xf32, #tpu.memory_space<vmem>>) attributes {dimension_semantics = [#tpu.dimension_semantics<parallel>, #tpu.dimension_semantics<arbitrary>], iteration_bounds = array<i64: 2, 4>, scalar_prefetch = 0 : i64, scratch_operands = 2 : i64, tpu.core_type = #tpu.core_type<tc>, window_params = [{transform_indices = @transform_0, window_bounds = array<i64: 1, 8, 32>}, {pipeline_mode = #tpu.pipeline_mode<synchronous>, transform_indices = @transform_1, window_bounds = array<i64: 1, 32>}, {pipeline_mode = #tpu.pipeline_mode<synchronous>, transform_indices = @transform_2, window_bounds = array<i64: 1, 32>}, {transform_indices = @transform_3, window_bounds = array<i64: 1, 32, 24>}, {transform_indices = @transform_4, window_bounds = array<i64: 1, 1, 24>}, {transform_indices = @transform_5, window_bounds = array<i64: 1, 8, 32>}, {pipeline_mode = #tpu.pipeline_mode<synchronous>, transform_indices = @transform_6, window_bounds = array<i64: 1, 32>}, {transform_indices = @transform_7, window_bounds = array<i64: 1, 8, 32>}]} {
    %c0_i32 = arith.constant 0 : i32
    %0 = arith.cmpi eq, %arg1, %c0_i32 : i32
    %1 = arith.extui %0 : i1 to i32
    %c0_i32_0 = arith.constant 0 : i32
    %2 = arith.cmpi ne, %1, %c0_i32_0 : i32
    scf.if %2 {
      %c0_22 = arith.constant 0 : index
      %c0_23 = arith.constant 0 : index
      %c0_24 = arith.constant 0 : index
      %42 = vector.load %arg2[%c0_22, %c0_23, %c0_24] : memref<1x8x32xf32, #tpu.memory_space<vmem>>, vector<1x8x32xf32>
      %43 = vector.shape_cast %42 : vector<1x8x32xf32> to vector<8x32xf32>
      %cst_25 = arith.constant dense<0.000000e+00> : vector<8xf32>
      %44 = vector.multi_reduction <add>, %43, %cst_25 [1] : vector<8x32xf32> to vector<8xf32>
      %45 = vector.shape_cast %44 : vector<8xf32> to vector<8x1xf32>
      %cst_26 = arith.constant 3.200000e+01 : f32
      %46 = vector.broadcast %cst_26 : f32 to vector<8x1xf32>
      %47 = arith.divf %45, %46 : vector<8x1xf32>
      %48 = vector.broadcast %47 : vector<8x1xf32> to vector<8x32xf32>
      %49 = arith.subf %43, %48 : vector<8x32xf32>
      %50 = arith.mulf %49, %49 : vector<8x32xf32>
      %cst_27 = arith.constant dense<0.000000e+00> : vector<8xf32>
      %51 = vector.multi_reduction <add>, %50, %cst_27 [1] : vector<8x32xf32> to vector<8xf32>
      %52 = vector.shape_cast %51 : vector<8xf32> to vector<8x1xf32>
      %cst_28 = arith.constant 3.200000e+01 : f32
      %53 = vector.broadcast %cst_28 : f32 to vector<8x1xf32>
      %54 = arith.divf %52, %53 : vector<8x1xf32>
      %55 = vector.broadcast %47 : vector<8x1xf32> to vector<8x32xf32>
      %56 = arith.subf %43, %55 : vector<8x32xf32>
      %cst_29 = arith.constant 9.99999974E-6 : f32
      %57 = vector.broadcast %cst_29 : f32 to vector<8x1xf32>
      %58 = arith.addf %54, %57 : vector<8x1xf32>
      %59 = math.rsqrt %58 : vector<8x1xf32>
      %60 = vector.broadcast %59 : vector<8x1xf32> to vector<8x32xf32>
      %61 = arith.mulf %56, %60 : vector<8x32xf32>
      %c0_30 = arith.constant 0 : index
      %c0_31 = arith.constant 0 : index
      %62 = vector.load %arg3[%c0_30, %c0_31] : memref<1x32xf32, #tpu.memory_space<vmem>>, vector<1x32xf32>
      %63 = vector.broadcast %62 : vector<1x32xf32> to vector<8x32xf32>
      %64 = arith.mulf %61, %63 : vector<8x32xf32>
      %c0_32 = arith.constant 0 : index
      %c0_33 = arith.constant 0 : index
      %65 = vector.load %arg4[%c0_32, %c0_33] : memref<1x32xf32, #tpu.memory_space<vmem>>, vector<1x32xf32>
      %66 = vector.broadcast %65 : vector<1x32xf32> to vector<8x32xf32>
      %67 = arith.addf %64, %66 : vector<8x32xf32>
      %68 = arith.truncf %67 : vector<8x32xf32> to vector<8x32xbf16>
      %c0_34 = arith.constant 0 : index
      %c0_35 = arith.constant 0 : index
      %69 = vector.load %arg10[%c0_34, %c0_35] : memref<8x32xbf16, #tpu.memory_space<vmem>>, vector<8x32xbf16>
      tpu.vector_store %arg10[%c0_34, %c0_35], %68 {strides = array<i32>} : memref<8x32xbf16, #tpu.memory_space<vmem>>, vector<8x32xbf16>,
      %cst_36 = arith.constant 0.000000e+00 : f32
      %70 = vector.broadcast %cst_36 : f32 to vector<8x32xf32>
      %c0_37 = arith.constant 0 : index
      %c0_38 = arith.constant 0 : index
      %71 = vector.load %arg11[%c0_37, %c0_38] : memref<8x32xf32, #tpu.memory_space<vmem>>, vector<8x32xf32>
      tpu.vector_store %arg11[%c0_37, %c0_38], %70 {strides = array<i32>} : memref<8x32xf32, #tpu.memory_space<vmem>>, vector<8x32xf32>,
    } else {
    }
    %c0 = arith.constant 0 : index
    %c0_1 = arith.constant 0 : index
    %3 = vector.load %arg10[%c0, %c0_1] : memref<8x32xbf16, #tpu.memory_space<vmem>>, vector<8x32xbf16>
    %c0_2 = arith.constant 0 : index
    %c0_3 = arith.constant 0 : index
    %c0_4 = arith.constant 0 : index
    %4 = vector.load %arg5[%c0_2, %c0_3, %c0_4] : memref<1x32x24xbf16, #tpu.memory_space<vmem>>, vector<1x32x24xbf16>
    %5 = vector.shape_cast %4 : vector<1x32x24xbf16> to vector<32x24xbf16>
    %cst = arith.constant dense<0.000000e+00> : vector<8x24xf32>
    %6 = tpu.matmul %3, %5, %cst {dimension_numbers = #tpu.dot_dimension_numbers<[1], [0], [0], [1], [0, 0, 1, 1], [], []>} : vector<8x32xbf16>, vector<32x24xbf16>, vector<8x24xf32> -> vector<8x24xf32>
    %c0_5 = arith.constant 0 : index
    %c0_6 = arith.constant 0 : index
    %c0_7 = arith.constant 0 : index
    %7 = vector.load %arg6[%c0_5, %c0_6, %c0_7] : memref<1x1x24xf32, #tpu.memory_space<vmem>>, vector<1x1x24xf32>
    %8 = vector.shape_cast %7 : vector<1x1x24xf32> to vector<1x24xf32>
    %9 = vector.broadcast %8 : vector<1x24xf32> to vector<8x24xf32>
    %10 = arith.addf %6, %9 : vector<8x24xf32>
    %11 = vector.extract_strided_slice %10 {offsets = [0, 0], sizes = [8, 8], strides = [1, 1]} : vector<8x24xf32> to vector<8x8xf32>
    %12 = arith.truncf %11 : vector<8x8xf32> to vector<8x8xbf16>
    %13 = vector.extract_strided_slice %10 {offsets = [0, 8], sizes = [8, 8], strides = [1, 1]} : vector<8x24xf32> to vector<8x8xf32>
    %14 = arith.truncf %13 : vector<8x8xf32> to vector<8x8xbf16>
    %15 = vector.extract_strided_slice %10 {offsets = [0, 16], sizes = [8, 8], strides = [1, 1]} : vector<8x24xf32> to vector<8x8xf32>
    %16 = arith.truncf %15 : vector<8x8xf32> to vector<8x8xbf16>
    %cst_8 = arith.constant dense<0.000000e+00> : vector<8x8xf32>
    %17 = tpu.matmul %12, %14, %cst_8 {dimension_numbers = #tpu.dot_dimension_numbers<[1], [1], [0], [0], [0, 0, 1, 0], [], []>} : vector<8x8xbf16>, vector<8x8xbf16>, vector<8x8xf32> -> vector<8x8xf32>
    %cst_9 = arith.constant 0.353553385 : f32
    %18 = vector.broadcast %cst_9 : f32 to vector<8x8xf32>
    %19 = arith.mulf %17, %18 : vector<8x8xf32>
    %cst_10 = arith.constant dense<0xFF800000> : vector<8xf32>
    %20 = vector.multi_reduction <maximumf>, %19, %cst_10 [1] : vector<8x8xf32> to vector<8xf32>
    %21 = vector.shape_cast %20 : vector<8xf32> to vector<8x1xf32>
    %22 = vector.broadcast %21 : vector<8x1xf32> to vector<8x8xf32>
    %23 = arith.subf %19, %22 : vector<8x8xf32>
    %24 = math.exp %23 : vector<8x8xf32>
    %cst_11 = arith.constant dense<0.000000e+00> : vector<8xf32>
    %25 = vector.multi_reduction <add>, %24, %cst_11 [1] : vector<8x8xf32> to vector<8xf32>
    %26 = vector.shape_cast %25 : vector<8xf32> to vector<8x1xf32>
    %27 = tpu.reciprocal %26 {approx = true} : vector<8x1xf32> -> vector<8x1xf32>
    %28 = vector.broadcast %27 : vector<8x1xf32> to vector<8x8xf32>
    %29 = arith.mulf %24, %28 : vector<8x8xf32>
    %30 = arith.truncf %29 : vector<8x8xf32> to vector<8x8xbf16>
    %cst_12 = arith.constant dense<0.000000e+00> : vector<8x8xf32>
    %31 = tpu.matmul %30, %16, %cst_12 {dimension_numbers = #tpu.dot_dimension_numbers<[1], [0], [0], [1], [0, 0, 1, 1], [], []>} : vector<8x8xbf16>, vector<8x8xbf16>, vector<8x8xf32> -> vector<8x8xf32>
    %c0_13 = arith.constant 0 : index
    %c0_14 = arith.constant 0 : index
    %32 = vector.load %arg11[%c0_13, %c0_14] : memref<8x32xf32, #tpu.memory_space<vmem>>, vector<8x32xf32>
    %33 = arith.truncf %31 : vector<8x8xf32> to vector<8x8xbf16>
    %c0_15 = arith.constant 0 : index
    %c0_16 = arith.constant 0 : index
    %c0_17 = arith.constant 0 : index
    %34 = vector.load %arg7[%c0_15, %c0_16, %c0_17] : memref<1x8x32xbf16, #tpu.memory_space<vmem>>, vector<1x8x32xbf16>
    %35 = vector.shape_cast %34 : vector<1x8x32xbf16> to vector<8x32xbf16>
    %cst_18 = arith.constant dense<0.000000e+00> : vector<8x32xf32>
    %36 = tpu.matmul %33, %35, %cst_18 {dimension_numbers = #tpu.dot_dimension_numbers<[1], [0], [0], [1], [0, 0, 1, 1], [], []>} : vector<8x8xbf16>, vector<8x32xbf16>, vector<8x32xf32> -> vector<8x32xf32>
    %37 = arith.addf %32, %36 : vector<8x32xf32>
    %c0_19 = arith.constant 0 : index
    %c0_20 = arith.constant 0 : index
    %38 = vector.load %arg11[%c0_19, %c0_20] : memref<8x32xf32, #tpu.memory_space<vmem>>, vector<8x32xf32>
    tpu.vector_store %arg11[%c0_19, %c0_20], %37 {strides = array<i32>} : memref<8x32xf32, #tpu.memory_space<vmem>>, vector<8x32xf32>,
    %c3_i32 = arith.constant 3 : i32
    %39 = arith.cmpi eq, %arg1, %c3_i32 : i32
    %40 = arith.extui %39 : i1 to i32
    %c0_i32_21 = arith.constant 0 : i32
    %41 = arith.cmpi ne, %40, %c0_i32_21 : i32
    scf.if %41 {
      %c0_22 = arith.constant 0 : index
      %c0_23 = arith.constant 0 : index
      %42 = vector.load %arg11[%c0_22, %c0_23] : memref<8x32xf32, #tpu.memory_space<vmem>>, vector<8x32xf32>
      %c0_24 = arith.constant 0 : index
      %c0_25 = arith.constant 0 : index
      %43 = vector.load %arg8[%c0_24, %c0_25] : memref<1x32xf32, #tpu.memory_space<vmem>>, vector<1x32xf32>
      %44 = vector.broadcast %43 : vector<1x32xf32> to vector<8x32xf32>
      %45 = arith.addf %42, %44 : vector<8x32xf32>
      %c0_26 = arith.constant 0 : index
      %c0_27 = arith.constant 0 : index
      %c0_28 = arith.constant 0 : index
      %46 = vector.load %arg9[%c0_26, %c0_27, %c0_28] : memref<1x8x32xf32, #tpu.memory_space<vmem>>, vector<1x8x32xf32>
      %47 = vector.shape_cast %46 : vector<1x8x32xf32> to vector<8x32xf32>
      %48 = vector.shape_cast %45 : vector<8x32xf32> to vector<1x8x32xf32>
      tpu.vector_store %arg9[%c0_26, %c0_27, %c0_28], %48 {strides = array<i32>} : memref<1x8x32xf32, #tpu.memory_space<vmem>>, vector<1x8x32xf32>,
    } else {
    }
    return
  }
  func.func @transform_0(%arg0: i32, %arg1: i32) -> (i32, i32, i32) {
    %c0_i32 = arith.constant 0 : i32
    %c0_i32_0 = arith.constant 0 : i32
    %c0_i32_1 = arith.constant 0 : i32
    return %arg0, %c0_i32, %c0_i32_0 : i32, i32, i32
  }
  func.func @transform_1(%arg0: i32, %arg1: i32) -> (i32, i32) {
    %c0_i32 = arith.constant 0 : i32
    %c0_i32_0 = arith.constant 0 : i32
    %c0_i32_1 = arith.constant 0 : i32
    return %c0_i32, %c0_i32_0 : i32, i32
  }
  func.func @transform_2(%arg0: i32, %arg1: i32) -> (i32, i32) {
    %c0_i32 = arith.constant 0 : i32
    %c0_i32_0 = arith.constant 0 : i32
    %c0_i32_1 = arith.constant 0 : i32
    return %c0_i32, %c0_i32_0 : i32, i32
  }
  func.func @transform_3(%arg0: i32, %arg1: i32) -> (i32, i32, i32) {
    %c0_i32 = arith.constant 0 : i32
    %c0_i32_0 = arith.constant 0 : i32
    %c0_i32_1 = arith.constant 0 : i32
    return %arg1, %c0_i32, %c0_i32_0 : i32, i32, i32
  }
  func.func @transform_4(%arg0: i32, %arg1: i32) -> (i32, i32, i32) {
    %c0_i32 = arith.constant 0 : i32
    %c0_i32_0 = arith.constant 0 : i32
    %c0_i32_1 = arith.constant 0 : i32
    return %arg1, %c0_i32, %c0_i32_0 : i32, i32, i32
  }
  func.func @transform_5(%arg0: i32, %arg1: i32) -> (i32, i32, i32) {
    %c0_i32 = arith.constant 0 : i32
    %c0_i32_0 = arith.constant 0 : i32
    %c0_i32_1 = arith.constant 0 : i32
    return %arg1, %c0_i32, %c0_i32_0 : i32, i32, i32
  }
  func.func @transform_6(%arg0: i32, %arg1: i32) -> (i32, i32) {
    %c0_i32 = arith.constant 0 : i32
    %c0_i32_0 = arith.constant 0 : i32
    %c0_i32_1 = arith.constant 0 : i32
    return %c0_i32, %c0_i32_0 : i32, i32
  }
  func.func @transform_7(%arg0: i32, %arg1: i32) -> (i32, i32, i32) {
    %c0_i32 = arith.constant 0 : i32
    %c0_i32_0 = arith.constant 0 : i32
    %c0_i32_1 = arith.constant 0 : i32
    return %arg0, %c0_i32, %c0_i32_0 : i32, i32, i32
  }
}

</mosaic_0001>

<bundles_post_ra>
// kernel: tpu_custom_call.1
= control target key start
LH: loop header
LB: loop body
LE: loop exit
PB: predicated region body
PF: predicated region fallthrough
CT: control target
= control target key end

     0   :  { %12 = vsyncpa [#allocation5], 0  ;;  %s1209_s0 = inlined_call_operand.vmem [shape: f32[2,8,32], index: 0, kind: input, shape index: {}]   ;;  %s1210_s1 = inlined_call_operand.vmem [shape: f32[1,32], index: 1, kind: input, shape index: {}]   ;;  %s1211_s2 = inlined_call_operand.vmem [shape: f32[1,32], index: 2, kind: input, shape index: {}]   ;;  %s1212_s3 = inlined_call_operand.vmem [shape: bf16[4,32,24], index: 3, kind: input, shape index: {}]   ;;  %s1213_s4 = inlined_call_operand.vmem [shape: f32[4,1,24], index: 4, kind: input, shape index: {}]   ;;  %s1214_s5 = inlined_call_operand.vmem [shape: bf16[4,8,32], index: 5, kind: input, shape index: {}]   ;;  %s1215_s6 = inlined_call_operand.vmem [shape: f32[1,32], index: 6, kind: input, shape index: {}]   ;;  %s1216_s7 = inlined_call_operand.hbm [shape: f32[2,8,32], index: 7, kind: output, shape index: {}]  }
   0x1   :  { %14 = vsyncpa [#allocation5 + $0x1], 0  ;;  %s1027_s24 = smov 0   ;;  %s1029_s25 = smov 0  }
   0x2   :  { %s1031_s26 = smov 0   ;;  %s1033_s27 = smov 0  }
   0x3   :  { %s1035_s28 = smov 0   ;;  %s1037_s29 = smov 0  }
   0x4   :  { %s1039_s30 = smov 0   ;;  %s1041_s8 = smov 0  }
   0x5 LB: > { %1224 = sst [smem:[#allocation7_spill]] %s951_s24  ;;  %s741_s9 = sadd.s32 4294967295, %s979_s8   ;;  %s979_s8 = sphi %s1041_s8, %s20_s8   ;;  %s975_s30 = sphi %s1039_s30, %s1242_s30   ;;  %s971_s29 = sphi %s1037_s29, %s1241_s29   ;;  %s967_s28 = sphi %s1035_s28, %s1240_s28   ;;  %s963_s27 = sphi %s1033_s27, %s1239_s27   ;;  %s959_s26 = sphi %s1031_s26, %s1238_s26   ;;  %s955_s25 = sphi %s1029_s25, %s1244_s25   ;;  %s951_s24 = sphi %s1027_s24, %s1243_s24  }
   0x6   : > { %1225 = sst [smem:[#allocation8_spill]] %s959_s26  ;;  %s742_s10 = sadd.s32 4294967294, %s979_s8  }
   0x7   : > { %1226 = sst [smem:[#allocation9_spill]] %s971_s29  ;;  %s29_s11 = sadd.s32 1, %s971_s29 }
   0x8   : > { %1227 = sst [smem:[#allocation10_spill]] %s975_s30  ;;  %p30_p0 = scmp.ge.s32.totalorder %s29_s11, 4 }
   0x9   : > { %s32_s12 = sadd.s32 1, %s975_s30  ;;  %p216_p1 = scmp.ne.s32.totalorder %s959_s26, %s955_s25 }
   0xa   : > { %p217_p2 = scmp.eq.s32.totalorder %s741_s9, 7  ;;  %s1246_s11 = smov (%p30_p0, %s29_s11), 0 }
   0xb   : > { %1228 = sst [smem:[#allocation11_spill]] %s1246_s11  ;;  %s1248_s12 = smov (!%p30_p0, %s32_s12), %s975_s30 }
   0xc   : > { %p1076_p3 = por %p217_p2, %p216_p1  ;;  %p222_p4 = scmp.ne.s32.totalorder %s955_s25, %s951_s24 }
   0xd   : > { %p34_p5 = scmp.ge.s32.totalorder %s1248_s12, 2  ;;  %p223_p6 = scmp.eq.s32.totalorder %s742_s10, 7 }
   0xe   : > { %p745_p7 = scmp.ge.s32.totalorder %s979_s8, 1  ;;  %p278_p8 = scmp.lt.s32.totalorder %s979_s8, 9 }
   0xf   : > { %s1250_s12 = smov (%p34_p5, %s1248_s12), 0  ;;  %p1086_p9 = por %p223_p6, %p222_p4 }
  0x10   : > { %1230 = sst [smem:[#allocation12_spill]] %s1250_s12  ;;  %p279_p10 = pnand %p745_p7, %p278_p8 }
  0x11   : > { %s1231_s14 = scalar_select %p1086_p9, 1, 0 }
  0x12   : > { %s203_s15 = ssub.s32 %s975_s30, %s1250_s12  ;;  %s206_s16 = sadd.s32 1, %s959_s26 }
  0x13   : > { %1232 = sst [smem:[#allocation13_spill]] %s1231_s14  ;;  %p204_p11 = scmp.eq.s32.totalorder %s203_s15, 0 }
  0x14   : > { %282 = sbr.rel (%p279_p10) target bundleno = 1610 (0x64a), region = 48  ;;  %s1218_s18 = sand.u32 (!%p279_p10), 1, %s955_s25  }
  0x15   : > { %s1094_s17 = scalar_select %p204_p11, %s959_s26, %s206_s16  }
  0x16   : > { %p321_p12 = scmp.lt.s32.totalorder (!%p279_p10), %s967_s28, 1  ;;  %s1100_s19 = sshll.u32 (!%p279_p10), %s1218_s18, 3 }
  0x17   : > { %1233 = sst [smem:[#allocation14_spill]] %s1094_s17  ;;  %p325_p13 = scmp.lt.s32.totalorder (!%p279_p10), %s963_s27, 3 }
  0x18   : > { %p751_p0 = scmp.ne.s32.totalorder (!%p279_p10), %s963_s27, 0 }
  0x19   : > { %s322_s20 = scalar_select %p321_p12, %s967_s28, 1 }
  0x1a   : > { %s1105_s21 = scalar_select %p325_p13, %s963_s27, 3 }
  0x1b   : > { %s747_s22 = sshll.u32 %s322_s20, 3  ;;  %s320_s20 = scalar_lea.vmem [#allocation4], %s1100_s19 }
  0x1c   : > { %s324_s10 = scalar_lea.vmem %s1209_s0, %s747_s22  ;;  %s767_s15 = sshll.u32 %s1105_s21, 4 }
  0x1d   : > { %s1114_s11 = scalar_lea.vmem %s1212_s3, %s767_s15  ;;  %s332_s29 = scalar_lea.vmem %s1213_s4, %s1105_s21 }
  0x1e   : > { %s750_s17 = sshll.u32 %s1105_s21, 2  ;;  %341 = sbr.rel (%p751_p0) target bundleno = 347 (0x15b), region = 52 }
  0x1f   : > { %s1124_s24 = scalar_lea.vmem %s1214_s5, %s750_s17 }
  0x23   : > { %v342_v0 = vld [vmem:[%s324_s10] sm:$0xff]  ;;  %vm343_vm0 = vcmask 261120   ;;  %v981_v2 = vmov 0.0   ;;  %vm375_vm1 = vcmask 257024  }
  0x24   : > { %v344_v1 = vsel %vm343_vm0, %v342_v0, 0.0  ;;  %377 = vst.msk [vmem:[#allocation3] sm:$0xff] %vm343_vm0, %v981_v2  ;;  %v752_v12 = vld [vmem:[%s1210_s1] ss:$0 sm:$0xff] }
  0x25   : > { %345 = vadd.xlane.f32.xlu0 %v344_v1  ;;  %v753_v14 = vld [vmem:[%s1211_s2] ss:$0 sm:$0xff] }
  0xae   : > { %v346_v3 = vpop.xlane.xlu0 %345 }
  0xaf   : > { %v348_v4 = vmul.f32 0.03125, %v346_v3 }
  0xb1   : > { %v349_v5 = vsub.f32 %v342_v0, %v348_v4 }
  0xb3   : > { %v350_v6 = vmul.f32 %v349_v5, %v349_v5 }
  0xb5   : > { %v351_v7 = vsel %vm343_vm0, %v350_v6, 0.0 }
  0xb6   : > { %352 = vadd.xlane.f32.xlu0 %v351_v7 }
 0x13f   : > { %v353_v8 = vpop.xlane.xlu0 %352 }
 0x140   : > { %v354_v9 = vmul.f32 0.03125, %v353_v8 }
 0x142   : > { %v355_v10 = vadd.f32 1e-05, %v354_v9 }
 0x144   : > { %879 = vrsqrt.f32 %v355_v10 }
 0x151   : > { %v880_v11 = vpop.eup %879 }
 0x152   : > { %v357_v13 = vmul.f32 %v880_v11, %v349_v5 }
 0x154   : > { %v365_v15 = vmul.f32 %v752_v12, %v357_v13 }
 0x156   : > { %v373_v16 = vadd.f32 %v753_v14, %v365_v15 }
 0x158   : > { %v374_v17 = vpack.c.bf16 %v373_v16, %v373_v16 }
 0x15a   : > { %376 = vst.msk [vmem:[#allocation2] sm:$0xf] %vm375_vm1, %v374_v17 }
 0x15b PF: > { %v881_v18 = vld [vmem:[%s1114_s11 + $0x8] sm:$0xff]   ;;  %v982_v19 = vmov 0.0   ;;  %v882_v20 = vld [vmem:[%s1114_s11] sm:$0xff]   ;;  %vm983_vm2 = vmmov 0   ;;  %vm402_vm3 = vcmask 261120   ;;  %s984_s11 = smov 120  }
 0x15c   : > { %777 = vmatprep.subr.bf16.mxu0 %v982_v19  ;;  %785 = vmatprep.subr.bf16.mxu1 %v982_v19  ;;  %v754_v22 = vld [vmem:[%s332_s29] ss:$0 sm:$0xff]  ;;  %vm450_vm4 = vcmask 64512   ;;  %vm515_vm5 = vcmask 1043456   ;;  %s985_s29 = smov 112   ;;  %v559_v55 = vld [vmem:[#allocation3] sm:$0xff] }
 0x15d   : > { %778 = vmatpush3.bf16.msra.mxu0 %v881_v18  ;;  %781 = vmatprep.mubr.msk.bf16.mxu0 %vm983_vm2, %v982_v19  ;;  %v561_v42 = vld [vmem:[%s1124_s24] sm:$0xf]  ;;  %p761_p1 = scmp.ne.s32.totalorder %s963_s27, 3 }
 0x15e   : > { %779 = vmatprep.subr.bf16.mxu0 %v982_v19  ;;  %787 = vmatprep.mubr.msk.bf16.mxu1 %vm983_vm2, %v982_v19  ;;  %v566_v43 = vsel %vm515_vm5, %v561_v42, 0 }
 0x161   : > { %780 = vmatpush3.bf16.msra.mxu0 %v882_v20  ;;  %v378_v21 = vld [vmem:[#allocation2] sm:$0xf] }
 0x162   : > { %791 = vmatprep.subr.bf16.mxu0 %v982_v19 }
 0x164   : > { %782 = vmatmul.mubr.msk.bf16.vlgmr.msra.gmra.mxu0 %vm402_vm3, %v378_v21 }
 0x165   : > { %793 = vmatprep.mubr.msk.bf16.mxu0 %vm983_vm2, %v982_v19 }
 0x224   : > { %v440_v23 = vpop.f32.mrf.mxu0 }
 0x225   : > { %v441_v24 = vadd.f32 %v754_v22, %v440_v23 }
 0x226   : > { %v783_v25 = vpop.f32.mrf.mxu0 }
 0x227   : > { %v446_v26 = vpack.c.bf16 %v441_v24, %v441_v24 }
 0x228   : > { %v443_v27 = vpop.f32.mrf.mxu0 }
 0x229   : > { %448 = vrot.lane.b32.xlu0 %v446_v26, %s984_s11 }
 0x22a   : > { %v784_v28 = vpop.f32.mrf.mxu0 }
 0x29b   : > { %v449_v29 = vpop.permute.xlu0 %448 }
 0x29c   : > { %v455_v30 = vsel %vm450_vm4, %v449_v29, 0 }
 0x29d   : > { %786 = vmatpush3.bf16.xpose.msra.mxu1 %v455_v30 }
 0x29e   : > { %797 = vmatprep.subr.bf16.mxu1 %v982_v19 }
 0x2a4   : > { %788 = vmatmul.mubr.msk.bf16.vlgmr.msra.gmra.mxu1 %vm450_vm4, %v446_v26 }
 0x2a5   : > { %799 = vmatprep.mubr.msk.bf16.mxu1 %vm983_vm2, %v982_v19  ;;  %798 = vmatpush3.bf16.msra.mxu1 %v566_v43 }
 0x364   : > { %v491_v31 = vpop.f32.mrf.mxu1 }
 0x365   : > { %v497_v32 = vmul.f32 0.35355338, %v491_v31 }
 0x366   : > { %v789_v33 = vpop.f32.mrf.mxu1 }
 0x367   : > { %v498_v34 = vsel %vm450_vm4, %v497_v32, -inf }
 0x368   : > { %499 = vmax.xlane.f32.xlu0 %v498_v34  ;;  %v494_v35 = vpop.f32.mrf.mxu1 }
 0x36a   : > { %v790_v36 = vpop.f32.mrf.mxu1 }
 0x3f1   : > { %v500_v37 = vpop.xlane.xlu0 %499 }
 0x3f2   : > { %v501_v38 = vsub.f32 %v497_v32, %v500_v37 }
 0x3f4   : > { %v502_v39 = vmul.f32 1.442695, %v501_v38 }
 0x3f6   : > { %883 = vpow2.f32 %v502_v39 }
 0x403   : > { %v884_v40 = vpop.eup %883 }
 0x404   : > { %v504_v41 = vsel %vm450_vm4, %v884_v40, 0.0 }
 0x405   : > { %505 = vadd.xlane.f32.xlu1 %v504_v41 }
 0x416   : > { %510 = vrot.lane.b32.xlu1 %v446_v26, %s985_s29 }
 0x48e   : > { %v506_v44 = vpop.xlane.xlu1 %505 }
 0x48f   : > { %885 = vrcp.f32 %v506_v44 }
 0x492   : > { %v511_v45 = vpop.permute.xlu1 %510 }
 0x493   : > { %v517_v46 = vsel %vm515_vm5, %v511_v45, 0 }
 0x494   : > { %792 = vmatpush3.bf16.msra.mxu0 %v517_v46 }
 0x49c   : > { %v886_v47 = vpop.eup %885 }
 0x49d   : > { %v508_v48 = vmul.f32 %v886_v47, %v884_v40 }
 0x49f   : > { %v509_v49 = vpack.c.bf16 %v508_v48, %v508_v48 }
 0x4a1   : > { %794 = vmatmul.mubr.msk.bf16.vlgmr.msra.gmra.mxu0 %vm450_vm4, %v509_v49 }
 0x561   : > { %v553_v50 = vpop.f32.mrf.mxu0 }
 0x562   : > { %v560_v51 = vpack.c.bf16 %v553_v50, %v553_v50 }
 0x563   : > { %v795_v52 = vpop.f32.mrf.mxu0 }
 0x564   : > { %800 = vmatmul.mubr.msk.bf16.vlgmr.msra.gmra.mxu1 %vm450_vm4, %v560_v51 }
 0x565   : > { %v556_v53 = vpop.f32.mrf.mxu0 }
 0x567   : > { %v796_v54 = vpop.f32.mrf.mxu0 }
 0x624   : > { %v602_v56 = vpop.f32.mrf.mxu1 }
 0x625   : > { %v608_v57 = vadd.f32 %v602_v56, %v559_v55 }
 0x626   : > { %v801_v58 = vpop.f32.mrf.mxu1  ;;  %613 = sbr.rel (%p761_p1) target bundleno = 1586 (0x632), region = 56 }
 0x627   : > { %609 = vst.msk [vmem:[#allocation3] sm:$0xff] %vm402_vm3, %v608_v57 }
 0x628   : > { %v605_v59 = vpop.f32.mrf.mxu1 }
 0x62a   : > { %v802_v60 = vpop.f32.mrf.mxu1 }
 0x62b   : > { %v762_v62 = vld [vmem:[%s1215_s6] ss:$0 sm:$0xff] }
 0x62e   : > { %v614_v61 = vld [vmem:[#allocation3] sm:$0xff] }
 0x62f   : > { %v622_v63 = vadd.f32 %v762_v62, %v614_v61 }
 0x631   : > { %623 = vst.msk [vmem:[%s320_s20] sm:$0xff] %vm402_vm3, %v622_v63 }
 0x632 PF: > { %s764_s22 = sshll.u32 %s967_s28, 7  ;;  %s638_s10 = sshll.u32 %s320_s20, 4  ;;  %s639_s10 = int_to_ptr.vmem [resolvable:$true] %s638_s10 }
 0x633   : > { %s636_s27 = scalar_lea.hbm %s1216_s7, %s764_s22  ;;  %s1234_s15 = sand.u32 1, %s955_s25  }
 0x634   : > { %s625_s16 = scalar_lea.sflag [#allocation5], %s1234_s15  ;;  %s887_s26 = scalar_lea.vmem %s639_s10, 128 }
 0x635   : > { %p888_p2 = scmp.ne.s32.totalorder %s639_s10, %s887_s26  ;;  %s986_s30 = smov [#allocation4]  }
 0x636   : > { %s891_s12 = sshll.u32 %s986_s30, 4  ;;  %s892_s12 = int_to_ptr.vmem [resolvable:$false] %s891_s12 }
 0x637   : > { %p889_p4 = pnand %p888_p2, %p1076_p3  ;;  %s893_s14 = scalar_lea.vmem %s892_s12, 256 }
 0x638   : > { %p894_p6 = scmp.lt.s32.totalorder %s639_s10, %s892_s12  ;;  %p895_p7 = scmp.lt.s32.totalorder %s893_s14, %s887_s26 }
 0x639   : > { %p890_p5 = pneg %p889_p4 }
 0x63a   : > { %p896_p8 = por %p895_p7, %p894_p6 }
 0x63c   : > { %p897_p10 = pnand %p896_p8, %p890_p5 }
 0x63e   : > { %900 = shalt.err (!%p897_p10)
}
 0x63f   : > { %s901_s28 = scalar_lea.hbm %s636_s27, 128  ;;  %s905_s17 = scalar_lea.hbm %s1216_s7, 256 }
 0x640   : > { %p902_p11 = scmp.ne.s32.totalorder %s636_s27, %s901_s28  ;;  %p906_p0 = scmp.lt.s32.totalorder %s636_s27, %s1216_s7 }
 0x641   : > { %p907_p1 = scmp.lt.s32.totalorder %s905_s17, %s901_s28 }
 0x642   : > { %p903_p12 = pnand %p902_p11, %p1076_p3 }
 0x643   : > { %p908_p2 = por %p907_p1, %p906_p0 }
 0x644   : > { %p904_p13 = pneg %p903_p12 }
 0x646   : > { %p909_p4 = pnand %p908_p2, %p904_p13 }
 0x648   : > { %912 = shalt.err (!%p909_p4)
}
 0x649   : > { %803 = dma.vmem_to_hbm [thread:$0]  (%p1076_p3), %s639_s10, 128, %s636_s27, %s625_s16  }
 0x64a PF: > { %s1235_s29 = sld [smem:[#allocation7_spill]]  ;;  %p809_p5 = scmp.ge.s32.totalorder %s979_s8, 2 }
 0x64c   : > { %p806_p6 = pnand %p809_p5, %p1086_p9 }
 0x64e   : > { %p807_p7 = pneg %p806_p6 }
 0x650   : > { %s650_s21 = sand.u32 1, %s1235_s29  }
 0x651   : > { %s651_s22 = scalar_lea.sflag [#allocation5], %s650_s21 }
 0x652   : > { %946 = dma.done.wait (%p807_p7), %s651_s22, 128  }
 0x653   : > { %948 = vsyncadd (%p807_p7), %s651_s22, 4294967168  ;;  %s20_s8 = sadd.s32 1, %s979_s8   ;;  %s1237_s23 = sld [smem:[#allocation8_spill]] }
 0x654   : > { %p17_p8 = scmp.ge.s32.totalorder %s20_s8, 10   ;;  %s1238_s26 = sld [smem:[#allocation14_spill]] }
 0x655   : > { %s1239_s27 = sld [smem:[#allocation9_spill]]  ;;  %s1243_s24 = smov %s955_s25 }
 0x656   : > { %s1240_s28 = sld [smem:[#allocation10_spill]]  ;;  %19 = sbr.rel (!%p17_p8) target bundleno = 5 (0x5), region = 100 }
 0x657   : > { %s1241_s29 = sld [smem:[#allocation11_spill]] }
 0x658   : > { %s1242_s30 = sld [smem:[#allocation12_spill]] }
 0x659   : > { %s1244_s25 = smov %s1237_s23 }
 0x65b   :  { %656 = vsyncpa [#allocation5], 1 }
 0x65c   :  { %658 = vsyncpa [#allocation5 + $0x1], 1 }

</bundles_post_ra>
